<compile_context>
chip_gen: v5e
topology: v5e:2x2
jax: 0.10.0
libtpu: 0.0.40
codegen_flags: <defaults>
</compile_context>

<pallas_src>
import functools

import numpy as np
import jax
import jax.numpy as jnp
from jax.experimental import pallas as pl
from jax.experimental.pallas import tpu as pltpu

_IGNORE_INDEX = -100  # F.cross_entropy default


# ----------------------- parameter construction (plain JAX/NumPy glue) -----

def get_binary_omega_list(omega, minority_class=1):
    if minority_class == 1:
        weights = [1.0 - omega, omega]
    else:
        weights = [omega, 1.0 - omega]
    return jnp.asarray(weights, dtype=jnp.float32)


def get_delta_list(class_dist, gamma):
    temp = (1.0 / np.asarray(class_dist, dtype=np.float64)) ** gamma
    delta_list = temp / np.min(temp)
    return jnp.asarray(delta_list, dtype=jnp.float32)


def get_iota_list(class_dist, tau):
    cls_probs = np.asarray(class_dist, dtype=np.float64) / float(np.sum(class_dist))
    iota_list = tau * np.log(cls_probs)
    return jnp.asarray(iota_list, dtype=jnp.float32)


def get_omega_list(class_dist, k=1):
    per_cls_weights = 1.0 / np.asarray(class_dist, dtype=np.float64) ** k
    per_cls_weights = per_cls_weights / np.sum(per_cls_weights) * len(class_dist)
    return jnp.asarray(per_cls_weights, dtype=jnp.float32)


# ----------------------------------- Pallas kernel --------------------------

def vs_loss_kernel(x_ref, tgt_ref, inv_delta_ref, iota_ref, w_ref, part_ref,
                   *, n_total):
    """One batch tile.

    x_ref:         (TM, C)  native dtype  logits (contiguous HBM slab)
    tgt_ref:       (1, TM)  i32           labels
    inv_delta_ref: (C, 1)   f32           precomputed 1/delta
    iota_ref:      (C, 1)   f32
    w_ref:         (C, 1)   f32           per-class weights
    part_ref:      (8, 256) f32  lanes [0:128]   = tile sum_n w[y]*nll (broadcast)
                                 lanes [128:256] = tile sum_n w[y]     (broadcast)
    """
    pid = pl.program_id(0)

    # Upcast then transpose ON-CHIP to the lane-dense (C, TM) layout: batch on
    # the 128-lane axis, classes on sublanes.  Cast to f32 BEFORE transposing so
    # the XLU transpose always sees a 32-bit (8x8-block) operand even for bf16
    # inputs with small C.
    xt = jnp.transpose(x_ref[...].astype(jnp.float32))              # (C, TM)
    tgt = tgt_ref[...]                                               # (1, TM)
    inv_delta = inv_delta_ref[...]                                   # (C, 1)
    iota_v = iota_ref[...]                                           # (C, 1)
    w = w_ref[...]                                                   # (C, 1)

    c, tm = xt.shape

    # Valid-sample mask: inside the real batch AND target in [0, C)
    # (handles block padding and F.cross_entropy's ignore_index=-100).
    col = jax.lax.broadcasted_iota(jnp.int32, (1, tm), 1) + pid * tm   # (1, TM)
    in_range = col < n_total
    valid = jnp.logical_and(in_range, jnp.logical_and(tgt >= 0, tgt < c))
    validf = valid.astype(jnp.float32)

    # VS logit adjustment: multiply by precomputed 1/delta (no vector divide).
    # The where() is load-bearing: padded rows / ignore_index rows can contain
    # stale-VMEM garbage (Inf/NaN) that would otherwise leak through lse.
    o = jnp.where(valid, xt * inv_delta + iota_v, 0.0)               # (C, TM)

    # One-hot * weight over the class (sublane) axis, built without a gather.
    cls_ids = jax.lax.broadcasted_iota(jnp.int32, (c, tm), 0)        # (C, TM)
    onehot_w = jnp.where(cls_ids == tgt, w, 0.0)                     # (C, TM)

    # Numerically stable logsumexp over classes (cheap sublane reductions).
    m = jnp.max(o, axis=0, keepdims=True)                            # (1, TM)
    lse = m + jnp.log(jnp.sum(jnp.exp(o - m), axis=0, keepdims=True))

    # Per-sample weighted NLL in ONE class reduction:
    #   sum_c onehot_w*(lse - o) = w[y]*(lse - o[y])
    losses = jnp.sum(onehot_w * (lse - o), axis=0, keepdims=True) * validf  # (1, TM)
    sample_w = jnp.sum(onehot_w, axis=0, keepdims=True) * validf            # (1, TM)

    # Tile partial sums over the batch (lane) axis, emitted as ONE lane-dense
    # (8, 256) block per step (single unmasked output DMA).
    loss_part = jnp.sum(losses, axis=1, keepdims=True)    # (1, 1)
    w_part = jnp.sum(sample_w, axis=1, keepdims=True)     # (1, 1)
    part_ref[:, 0:128] = jnp.broadcast_to(loss_part, (8, 128))
    part_ref[:, 128:256] = jnp.broadcast_to(w_part, (8, 128))


def _default_block_n(n, c, x_itemsize):
    """Batch tile: as large as a ~16 MiB VMEM budget allows (>= 1024 lanes so
    per-step overhead is amortized), capped so that large batches still produce
    >= 4 grid steps (keeps both v7x TensorCores streaming)."""
    n_pad = int(pl.cdiv(n, 128)) * 128
    # Per-sample VMEM cost: double-buffered native-dtype input tile plus ~6
    # f32 temporaries (o, exp, onehot, cls_ids, products) live across reductions.
    per_sample = 2 * c * x_itemsize + 6 * c * 4 + 8
    max_bn = max(1024, ((16 << 20) // per_sample) // 128 * 128)
    quarter = max(1024, int(pl.cdiv(int(pl.cdiv(n_pad, 4)), 128)) * 128)
    return int(min(n_pad, max_bn, quarter))


def vs_loss_lct_forward(x, target, delta_list, iota_list, weight, *, block_n=None):
    """x: (N, C) logits (any float dtype), target: (N,) int labels -> scalar f32."""
    n, c = x.shape
    if block_n is None:
        block_n = _default_block_n(n, c, x.dtype.itemsize)
    grid = int(pl.cdiv(n, block_n))

    # x goes straight to the kernel in its native dtype / native (N, C) layout.
    tgt = target.reshape(1, n).astype(jnp.int32)                    # (1, N)
    inv_delta = (1.0 / delta_list.astype(jnp.float32)).reshape(c, 1)
    iota2 = iota_list.astype(jnp.float32).reshape(c, 1)
    w2 = weight.astype(jnp.float32).reshape(c, 1)

    kernel = functools.partial(vs_loss_kernel, n_total=n)

    parts = pl.pallas_call(
        kernel,
        out_shape=jax.ShapeDtypeStruct((8, grid * 256), jnp.float32),
        grid=(grid,),
        in_specs=[
            # (block_n, C): C equals the full minor dim, so the HBM read is a
            # single contiguous slab; the transpose happens on-chip.
            pl.BlockSpec((block_n, c), lambda i: (i, 0)),            # logits tile
            pl.BlockSpec((1, block_n), lambda i: (0, i)),            # labels tile
            pl.BlockSpec((c, 1), lambda i: (0, 0)),                  # 1/delta
            pl.BlockSpec((c, 1), lambda i: (0, 0)),                  # iota
            pl.BlockSpec((c, 1), lambda i: (0, 0)),                  # class weights
        ],
        out_specs=pl.BlockSpec((8, 256), lambda i: (0, i)),
        compiler_params=pltpu.CompilerParams(
            dimension_semantics=("parallel",),   # both TCs stream on v7x
            vmem_limit_bytes=32 << 20,           # explicit; fits v7x's 64 MiB VMEM
        ),
    )(x, tgt, inv_delta, iota2, w2)

    # Tiny final reduction + normalization in plain JAX.
    # TODO(synk): on single-TC chips (v5e/v6e) an "arbitrary" batch axis with a
    # resident scalar accumulator would drop these trailing XLA ops entirely.
    p = parts.reshape(8, grid, 2, 128)
    loss_sum = jnp.sum(p[0, :, 0, 0])
    w_sum = jnp.sum(p[0, :, 1, 0])
    return loss_sum / w_sum


class VSLossLCTPallas:
    """JAX/Pallas port of VSLossLCT."""

    def __init__(self, class_dist, omega, gamma, tau):
        self.class_dist = class_dist
        if omega is None:
            self.omega_list = None
        elif len(class_dist) == 2:
            self.omega_list = get_binary_omega_list(omega)
        else:
            # Multi-class: omega unused (matches the PyTorch warning path).
            self.omega_list = get_omega_list(class_dist, k=1)
        self.delta_list = get_delta_list(class_dist, gamma) if gamma is not None else None
        self.iota_list = get_iota_list(class_dist, tau) if tau is not None else None

    def forward(self, x, target, hypers, *, block_n=None):
        # Hyperparameters not fixed at __init__ are read from `hypers` as concrete
        # host scalars, mirroring hypers[i].item() in the PyTorch module.
        # TODO(synk): a fully traced/jittable `hypers` path would require the
        # delta/iota/omega construction in jnp instead of host NumPy; prefer
        # fixing the hypers at __init__ (as in the demo) to avoid host syncs.
        i = 0
        if self.omega_list is not None:
            weight = self.omega_list
        else:
            if len(self.class_dist) == 2:
                weight = get_binary_omega_list(float(hypers[i]))
            else:
                weight = get_omega_list(self.class_dist, k=1)
            i += 1
        if self.delta_list is not None:
            delta_list = self.delta_list
        else:
            delta_list = get_delta_list(self.class_dist, float(hypers[i]))
            i += 1
        if self.iota_list is not None:
            iota_list = self.iota_list
        else:
            iota_list = get_iota_list(self.class_dist, float(hypers[i]))
            i += 1
        return vs_loss_lct_forward(x, target, delta_list, iota_list, weight,
                                   block_n=block_n)


# ----------------------------------- demo / check ---------------------------

def _reference_loss(x, target, delta_list, iota_list, weight, ignore_index=_IGNORE_INDEX):
    o = x / delta_list[None, :] + iota_list[None, :]
    logp = jax.nn.log_softmax(o, axis=-1)
    n = x.shape[0]
    mask = target != ignore_index
    tgt_safe = jnp.where(mask, target, 0)
    w_sel = jnp.where(mask, weight[tgt_safe], 0.0)
    nll = jnp.where(mask, -logp[jnp.arange(n), tgt_safe], 0.0)
    return jnp.sum(w_sel * nll) / jnp.sum(w_sel)


if __name__ == "__main__":
    # Multi-class long-tailed setup (small shapes).
    class_dist = [100, 50, 30, 20, 10, 8, 4, 2]   # C = 8 classes
    C = len(class_dist)
    N = 384

    loss_mod = VSLossLCTPallas(class_dist, omega=0.9, gamma=0.3, tau=1.0)

    key = jax.random.PRNGKey(0)
    kx, kt, kx2, kt2, kx3, kt3 = jax.random.split(key, 6)
    x = jax.random.normal(kx, (N, C), dtype=jnp.float32)
    target = jax.random.randint(kt, (N,), 0, C, dtype=jnp.int32)
    hypers = jnp.zeros((3,), dtype=jnp.float32)   # unused (all hypers fixed)

    # Case 1: batch tiled over a grid of 3 (block_n=128), "parallel" batch axis.
    loss = loss_mod.forward(x, target, hypers, block_n=128)
    loss = jax.block_until_ready(loss)
    ref = _reference_loss(x, target, loss_mod.delta_list, loss_mod.iota_list,
                          loss_mod.omega_list)
    assert jnp.allclose(loss, ref, rtol=1e-5, atol=1e-5), (loss, ref)

    # Case 2: batch not a multiple of 128 (padded tile) + one ignore_index target.
    N2 = 50
    x2 = jax.random.normal(kx2, (N2, C), dtype=jnp.float32)
    t2 = jax.random.randint(kt2, (N2,), 0, C, dtype=jnp.int32)
    t2 = t2.at[0].set(_IGNORE_INDEX)
    loss2 = loss_mod.forward(x2, t2, hypers)
    loss2 = jax.block_until_ready(loss2)
    ref2 = _reference_loss(x2, t2, loss_mod.delta_list, loss_mod.iota_list,
                           loss_mod.omega_list)
    assert jnp.allclose(loss2, ref2, rtol=1e-5, atol=1e-5), (loss2, ref2)

    # Case 3: bf16 logits DMA'd in their native dtype (upcast inside the kernel),
    # grid of 2.  The reference uses the same f32-converted values, so results
    # agree to f32 rounding.
    N3 = 256
    x3 = jax.random.normal(kx3, (N3, C), dtype=jnp.float32).astype(jnp.bfloat16)
    t3 = jax.random.randint(kt3, (N3,), 0, C, dtype=jnp.int32)
    loss3 = loss_mod.forward(x3, t3, hypers, block_n=128)
    loss3 = jax.block_until_ready(loss3)
    ref3 = _reference_loss(x3.astype(jnp.float32), t3, loss_mod.delta_list,
                           loss_mod.iota_list, loss_mod.omega_list)
    assert jnp.allclose(loss3, ref3, rtol=1e-5, atol=1e-5), (loss3, ref3)

    print("KERNEL_OK")
</pallas_src>

<mosaic_0001>
module attributes {stable_mosaic.version = 11 : i64} {
  func.func @vs_loss_kernel(%arg0: i32, %arg1: memref<128x8xf32, #tpu.memory_space<vmem>>, %arg2: memref<1x128xi32, #tpu.memory_space<vmem>>, %arg3: memref<8x1xf32, #tpu.memory_space<vmem>>, %arg4: memref<8x1xf32, #tpu.memory_space<vmem>>, %arg5: memref<8x1xf32, #tpu.memory_space<vmem>>, %arg6: memref<8x256xf32, #tpu.memory_space<vmem>>) attributes {dimension_semantics = [#tpu.dimension_semantics<parallel>], iteration_bounds = array<i64: 3>, scalar_prefetch = 0 : i64, scratch_operands = 0 : i64, tpu.core_type = #tpu.core_type<tc>, window_params = [{transform_indices = @transform_0, window_bounds = array<i64: 128, 8>}, {transform_indices = @transform_1, window_bounds = array<i64: 1, 128>}, {pipeline_mode = #tpu.pipeline_mode<synchronous>, transform_indices = @transform_2, window_bounds = array<i64: 8, 1>}, {pipeline_mode = #tpu.pipeline_mode<synchronous>, transform_indices = @transform_3, window_bounds = array<i64: 8, 1>}, {pipeline_mode = #tpu.pipeline_mode<synchronous>, transform_indices = @transform_4, window_bounds = array<i64: 8, 1>}, {transform_indices = @transform_5, window_bounds = array<i64: 8, 256>}]} {
    %c0 = arith.constant 0 : index
    %c0_0 = arith.constant 0 : index
    %0 = vector.load %arg1[%c0, %c0_0] : memref<128x8xf32, #tpu.memory_space<vmem>>, vector<128x8xf32>
    %1 = tpu.transpose %0, [1, 0] : vector<128x8xf32> -> vector<8x128xf32>
    %c0_1 = arith.constant 0 : index
    %c0_2 = arith.constant 0 : index
    %2 = vector.load %arg2[%c0_1, %c0_2] : memref<1x128xi32, #tpu.memory_space<vmem>>, vector<1x128xi32>
    %c0_3 = arith.constant 0 : index
    %c0_4 = arith.constant 0 : index
    %3 = vector.load %arg3[%c0_3, %c0_4] : memref<8x1xf32, #tpu.memory_space<vmem>>, vector<8x1xf32>
    %c0_5 = arith.constant 0 : index
    %c0_6 = arith.constant 0 : index
    %4 = vector.load %arg4[%c0_5, %c0_6] : memref<8x1xf32, #tpu.memory_space<vmem>>, vector<8x1xf32>
    %c0_7 = arith.constant 0 : index
    %c0_8 = arith.constant 0 : index
    %5 = vector.load %arg5[%c0_7, %c0_8] : memref<8x1xf32, #tpu.memory_space<vmem>>, vector<8x1xf32>
    %6 = tpu.iota {dimensions = array<i32: 1>} : vector<1x128xi32>
    %c128_i32 = arith.constant 128 : i32
    %7 = arith.muli %arg0, %c128_i32 : i32
    %8 = vector.broadcast %7 : i32 to vector<1x128xi32>
    %9 = arith.addi %6, %8 : vector<1x128xi32>
    %c384_i32 = arith.constant 384 : i32
    %10 = vector.broadcast %c384_i32 : i32 to vector<1x128xi32>
    %11 = arith.cmpi slt, %9, %10 : vector<1x128xi32>
    %c0_i32 = arith.constant 0 : i32
    %12 = vector.broadcast %c0_i32 : i32 to vector<1x128xi32>
    %13 = arith.cmpi sge, %2, %12 : vector<1x128xi32>
    %c8_i32 = arith.constant 8 : i32
    %14 = vector.broadcast %c8_i32 : i32 to vector<1x128xi32>
    %15 = arith.cmpi slt, %2, %14 : vector<1x128xi32>
    %16 = arith.andi %13, %15 : vector<1x128xi1>
    %17 = arith.andi %11, %16 : vector<1x128xi1>
    %18 = arith.extui %17 : vector<1x128xi1> to vector<1x128xi32>
    %19 = arith.sitofp %18 : vector<1x128xi32> to vector<1x128xf32>
    %20 = vector.broadcast %3 : vector<8x1xf32> to vector<8x128xf32>
    %21 = arith.mulf %1, %20 : vector<8x128xf32>
    %22 = vector.broadcast %4 : vector<8x1xf32> to vector<8x128xf32>
    %23 = arith.addf %21, %22 : vector<8x128xf32>
    %cst = arith.constant 0.000000e+00 : f32
    %24 = vector.shape_cast %17 : vector<1x128xi1> to vector<1x128xi1>
    %25 = vector.broadcast %24 : vector<1x128xi1> to vector<8x128xi1>
    %26 = vector.broadcast %cst : f32 to vector<8x128xf32>
    %27 = arith.select %25, %23, %26 : vector<8x128xi1>, vector<8x128xf32>
    %28 = tpu.iota {dimensions = array<i32: 0>} : vector<8x128xi32>
    %29 = vector.broadcast %2 : vector<1x128xi32> to vector<8x128xi32>
    %30 = arith.cmpi eq, %28, %29 : vector<8x128xi32>
    %cst_9 = arith.constant 0.000000e+00 : f32
    %31 = vector.shape_cast %5 : vector<8x1xf32> to vector<8x1xf32>
    %32 = vector.broadcast %31 : vector<8x1xf32> to vector<8x128xf32>
    %33 = vector.broadcast %cst_9 : f32 to vector<8x128xf32>
    %34 = arith.select %30, %32, %33 : vector<8x128xi1>, vector<8x128xf32>
    %cst_10 = arith.constant dense<0xFF800000> : vector<128xf32>
    %35 = vector.multi_reduction <maximumf>, %27, %cst_10 [0] : vector<8x128xf32> to vector<128xf32>
    %36 = vector.shape_cast %35 : vector<128xf32> to vector<1x128xf32>
    %37 = vector.broadcast %36 : vector<1x128xf32> to vector<8x128xf32>
    %38 = arith.subf %27, %37 : vector<8x128xf32>
    %39 = math.exp %38 : vector<8x128xf32>
    %cst_11 = arith.constant dense<0.000000e+00> : vector<128xf32>
    %40 = vector.multi_reduction <add>, %39, %cst_11 [0] : vector<8x128xf32> to vector<128xf32>
    %41 = vector.shape_cast %40 : vector<128xf32> to vector<1x128xf32>
    %42 = math.log %41 : vector<1x128xf32>
    %43 = arith.addf %36, %42 : vector<1x128xf32>
    %44 = vector.broadcast %43 : vector<1x128xf32> to vector<8x128xf32>
    %45 = arith.subf %44, %27 : vector<8x128xf32>
    %46 = arith.mulf %34, %45 : vector<8x128xf32>
    %cst_12 = arith.constant dense<0.000000e+00> : vector<128xf32>
    %47 = vector.multi_reduction <add>, %46, %cst_12 [0] : vector<8x128xf32> to vector<128xf32>
    %48 = vector.shape_cast %47 : vector<128xf32> to vector<1x128xf32>
    %49 = arith.mulf %48, %19 : vector<1x128xf32>
    %cst_13 = arith.constant dense<0.000000e+00> : vector<128xf32>
    %50 = vector.multi_reduction <add>, %34, %cst_13 [0] : vector<8x128xf32> to vector<128xf32>
    %51 = vector.shape_cast %50 : vector<128xf32> to vector<1x128xf32>
    %52 = arith.mulf %51, %19 : vector<1x128xf32>
    %cst_14 = arith.constant dense<0.000000e+00> : vector<1xf32>
    %53 = vector.multi_reduction <add>, %49, %cst_14 [1] : vector<1x128xf32> to vector<1xf32>
    %54 = vector.shape_cast %53 : vector<1xf32> to vector<1x1xf32>
    %cst_15 = arith.constant dense<0.000000e+00> : vector<1xf32>
    %55 = vector.multi_reduction <add>, %52, %cst_15 [1] : vector<1x128xf32> to vector<1xf32>
    %56 = vector.shape_cast %55 : vector<1xf32> to vector<1x1xf32>
    %57 = vector.shape_cast %54 : vector<1x1xf32> to vector<1x1xf32>
    %58 = vector.broadcast %57 : vector<1x1xf32> to vector<8x128xf32>
    %c0_16 = arith.constant 0 : index
    %c0_17 = arith.constant 0 : index
    %59 = vector.load %arg6[%c0_16, %c0_17] : memref<8x256xf32, #tpu.memory_space<vmem>>, vector<8x128xf32>
    tpu.vector_store %arg6[%c0_16, %c0_17], %58 {strides = array<i32>} : memref<8x256xf32, #tpu.memory_space<vmem>>, vector<8x128xf32>,
    %60 = vector.shape_cast %56 : vector<1x1xf32> to vector<1x1xf32>
    %61 = vector.broadcast %60 : vector<1x1xf32> to vector<8x128xf32>
    %c0_18 = arith.constant 0 : index
    %c128 = arith.constant 128 : index
    %62 = vector.load %arg6[%c0_18, %c128] : memref<8x256xf32, #tpu.memory_space<vmem>>, vector<8x128xf32>
    tpu.vector_store %arg6[%c0_18, %c128], %61 {strides = array<i32>} : memref<8x256xf32, #tpu.memory_space<vmem>>, vector<8x128xf32>,
    return
  }
  func.func @transform_0(%arg0: i32) -> (i32, i32) {
    %c0_i32 = arith.constant 0 : i32
    %c0_i32_0 = arith.constant 0 : i32
    return %arg0, %c0_i32 : i32, i32
  }
  func.func @transform_1(%arg0: i32) -> (i32, i32) {
    %c0_i32 = arith.constant 0 : i32
    %c0_i32_0 = arith.constant 0 : i32
    return %c0_i32, %arg0 : i32, i32
  }
  func.func @transform_2(%arg0: i32) -> (i32, i32) {
    %c0_i32 = arith.constant 0 : i32
    %c0_i32_0 = arith.constant 0 : i32
    %c0_i32_1 = arith.constant 0 : i32
    return %c0_i32, %c0_i32_0 : i32, i32
  }
  func.func @transform_3(%arg0: i32) -> (i32, i32) {
    %c0_i32 = arith.constant 0 : i32
    %c0_i32_0 = arith.constant 0 : i32
    %c0_i32_1 = arith.constant 0 : i32
    return %c0_i32, %c0_i32_0 : i32, i32
  }
  func.func @transform_4(%arg0: i32) -> (i32, i32) {
    %c0_i32 = arith.constant 0 : i32
    %c0_i32_0 = arith.constant 0 : i32
    %c0_i32_1 = arith.constant 0 : i32
    return %c0_i32, %c0_i32_0 : i32, i32
  }
  func.func @transform_5(%arg0: i32) -> (i32, i32) {
    %c0_i32 = arith.constant 0 : i32
    %c0_i32_0 = arith.constant 0 : i32
    return %c0_i32, %arg0 : i32, i32
  }
}

</mosaic_0001>

<bundles_post_ra>
// kernel: tpu_custom_call.1
= control target key start
LH: loop header
LB: loop body
LE: loop exit
PB: predicated region body
PF: predicated region fallthrough
CT: control target
= control target key end

     0   :  { %10 = vsyncpa [#allocation3], 0  ;;  %s749_s0 = inlined_call_operand.vmem [shape: f32[384,8], index: 0, kind: input, shape index: {}]   ;;  %s750_s1 = inlined_call_operand.vmem [shape: s32[1,384], index: 1, kind: input, shape index: {}]   ;;  %s751_s2 = inlined_call_operand.vmem [shape: f32[8,1], index: 2, kind: input, shape index: {}]   ;;  %s752_s3 = inlined_call_operand.vmem [shape: f32[8,1], index: 3, kind: input, shape index: {}]   ;;  %s753_s4 = inlined_call_operand.vmem [shape: f32[8,1], index: 4, kind: input, shape index: {}]   ;;  %s754_s5 = inlined_call_operand.hbm [shape: f32[8,768], index: 5, kind: output, shape index: {}]  }
   0x1   :  { %12 = vsyncpa [#allocation3 + $0x1], 0  ;;  %s618_s18 = smov 0   ;;  %s620_s19 = smov 0  }
   0x2   :  { %s622_s20 = smov 0   ;;  %s624_s21 = smov 0  }
   0x3 LB: > { %s639_s22 = sadd.s32 4294967295, %s584_s21   ;;  %s459_s23 = sadd.s32 4294967294, %s584_s21   ;;  %s584_s21 = sphi %s624_s21, %s762_s21   ;;  %s580_s20 = sphi %s622_s20, %s761_s20   ;;  %s576_s19 = sphi %s620_s19, %s760_s19   ;;  %s572_s18 = sphi %s618_s18, %s759_s18  }
   0x4   : > { %s643_s24 = sadd.s32 1, %s584_s21   ;;  %s140_s25 = sadd.s32 1, %s580_s20 }
   0x5   : > { %s137_s26 = ssub.s32 %s584_s21, %s643_s24  ;;  %p150_p0 = scmp.ne.s32.totalorder %s580_s20, %s576_s19 }
   0x6   : > { %p138_p1 = scmp.eq.s32.totalorder %s137_s26, 0  ;;  %p151_p2 = scmp.eq.s32.totalorder %s639_s22, 2 }
   0x7   : > { %p156_p3 = scmp.ne.s32.totalorder %s576_s19, %s572_s18  ;;  %p157_p4 = scmp.eq.s32.totalorder %s459_s23, 2 }
   0x8   : > { %s654_s27 = scalar_select %p138_p1, %s580_s20, %s140_s25  }
   0x9   : > { %p656_p5 = por %p151_p2, %p150_p0  ;;  %p660_p6 = por %p157_p4, %p156_p3 }
   0xa   : > { %p462_p7 = scmp.ge.s32.totalorder %s584_s21, 1  ;;  %p199_p8 = scmp.lt.s32.totalorder %s584_s21, 4 }
   0xc   : > { %p200_p9 = pnand %p462_p7, %p199_p8 }
   0xd   : > { %s667_s30 = sshll.u32 (!%p200_p9), %s639_s22, 4  ;;  %p236_p11 = scmp.lt.s32.totalorder (!%p200_p9), %s639_s22, 2 }
   0xe   : > { %203 = sbr.rel (%p200_p9) target bundleno = 380 (0x17c), region = 40  ;;  %p231_p10 = scmp.lt.s32.totalorder (!%p200_p9), %s667_s30, 47 }
   0xf   : > { %s466_s23 = sshll.u32 (!%p200_p9), %s639_s22, 7  ;;  %s386_s11 = scalar_lea.hbm (!%p200_p9), %s754_s5, %s667_s30 }
  0x10   : > { %s390_s13 = sshll.u32 (!%p200_p9), %s386_s11, 4  ;;  %s542_s25 = scalar_lea.hbm (!%p200_p9), %s754_s5, 48  ;;  %s391_s13 = int_to_ptr.hbm [resolvable:$true] %s390_s13 }
  0x11   : > { %s536_s15 = sshra.s32 (!%p200_p9), %s391_s13, 4  ;;  %s537_s15 = int_to_ptr.hbm [resolvable:$true] %s536_s15 }
  0x12   : > { %s538_s16 = scalar_lea.hbm (!%p200_p9), %s537_s15, 16  ;;  %p543_p1 = scmp.lt.s32.totalorder (!%p200_p9), %s537_s15, %s754_s5 }
  0x13   : > { %s232_s6 = scalar_select %p231_p10, %s667_s30, 47  ;;  %v586_v1 = vmov 0   ;;  %v289_v2 = vld [vmem:[%s751_s2] sm:$0xff]  ;;  %v292_v20 = vlaneseq  ;;  %v295_v22 = vstv %s466_s23  ;;  %v587_v52 = vmov 0.0  }
  0x14   : > { %515 = vset.pattern.permute.xlu0 %v586_v1  ;;  %516 = vset.pattern.permute.xlu2 %v586_v1  ;;  %v290_v4 = vld [vmem:[%s752_s3] sm:$0xff]  ;;  %s237_s17 = scalar_select %p236_p11, %s639_s22, 2  ;;  %vm363_vm7 = vcmask 1040384  }
  0x15   : > { %s465_s7 = sshll.u32 %s232_s6, 3  ;;  %306 = vperm.xlu0 %515, %v289_v2   ;;  %v291_v14 = vld [vmem:[%s753_s4] sm:$0xff]  ;;  %v293_v21 = vand.u32 127, %v292_v20  ;;  %v320_v35 = vshrl.u32 %v292_v20, 7  ;;  %s227_s22 = sand.u32 1, %s576_s19  }
  0x16   : > { %s674_s10 = scalar_lea.vmem %s749_s0, %s465_s7  ;;  %325 = vperm.xlu2 %516, %v291_v14   ;;  %s238_s6 = scalar_lea.vmem %s750_s1, %s237_s17 }
  0x17   : > { %v240_v0 = vld [vmem:[%s674_s10] sm:$0xff]  ;;  %v241_v3 = vld [vmem:[%s674_s10 + $0x8] sm:$0xff]  ;;  %v242_v5 = vld [vmem:[%s674_s10 + $0x10] sm:$0xff]  ;;  %v296_v24 = vadd.s32 %v295_v22, %v293_v21  ;;  %s463_s7 = sshll.u32 %s227_s22, 4  ;;  %s375_s14 = scalar_lea.sflag [#allocation3], %s227_s22 }
  0x18   : > { %256 = vxpose.xlu1.b32.start [1/16] (narrow) %v240_v0, 8  ;;  %v243_v6 = vld [vmem:[%s674_s10 + $0x18] sm:$0xff]  ;;  %v244_v7 = vld [vmem:[%s674_s10 + $0x20] sm:$0xff]  ;;  %v245_v8 = vld [vmem:[%s674_s10 + $0x28] sm:$0xff]  ;;  %s229_s8 = scalar_lea.vmem [#allocation2], %s463_s7  ;;  %p539_p12 = scmp.ne.s32.totalorder %s537_s15, %s538_s16 }
  0x19   : > { %v246_v9 = vld [vmem:[%s674_s10 + $0x30] sm:$0xff]  ;;  %v247_v10 = vld [vmem:[%s674_s10 + $0x38] sm:$0xff]  ;;  %v248_v11 = vld [vmem:[%s674_s10 + $0x40] sm:$0xff]  ;;  %vm297_vm2 = vcmp.lt.s32.totalorder %v296_v24, 384  ;;  %s388_s12 = sshll.u32 %s229_s8, 4  ;;  %p544_p2 = scmp.lt.s32.totalorder %s542_s25, %s538_s16  ;;  %s389_s12 = int_to_ptr.vmem [resolvable:$true] %s388_s12 }
  0x1a   : > { %v249_v12 = vld [vmem:[%s674_s10 + $0x48] sm:$0xff]  ;;  %v250_v13 = vld [vmem:[%s674_s10 + $0x50] sm:$0xff]  ;;  %v251_v15 = vld [vmem:[%s674_s10 + $0x58] sm:$0xff]  ;;  %p540_p13 = pnand %p539_p12, %p656_p5 }
  0x1b   : > { %v252_v16 = vld [vmem:[%s674_s10 + $0x60] sm:$0xff]  ;;  %v253_v17 = vld [vmem:[%s674_s10 + $0x68] sm:$0xff]  ;;  %v254_v18 = vld [vmem:[%s674_s10 + $0x70] sm:$0xff]  ;;  %p545_p3 = por %p544_p2, %p543_p1 }
  0x1c   : > { %v255_v19 = vld [vmem:[%s674_s10 + $0x78] sm:$0xff]  ;;  %v288_v23 = vld [vmem:[%s238_s6] sm:$0x1]  ;;  %p541_p0 = pneg %p540_p13 }
  0x1d   : > { %312 = vperm.xlu0 %515, %v290_v4   ;;  %vm298_vm0 = vcmp.ge.s32.totalorder %v288_v23, 0  ;;  %vm299_vm1 = vcmp.lt.s32.totalorder %v288_v23, 8  ;;  %v517_v36 = vld [vmem:[%s238_s6] ss:$0 sm:$0xff] }
  0x1e   : > { %vm300_vm3 = vmand %vm298_vm0, %vm299_vm1  ;;  %vm322_vm6 = vcmp.eq.s32.totalorder %v320_v35, %v517_v36  ;;  %p546_p4 = pnand %p545_p3, %p541_p0 }
  0x1f   : > { %vm707_vm4 = vmand %vm297_vm2, %vm300_vm3 }
  0x20   : > { %257 = vxpose.xlu1.b32.cont [2/16] (narrow) %v241_v3, 8  ;;  %v302_v27 = vsel %vm707_vm4, 1, %v586_v1  ;;  %v467_v53 = vsel %vm707_vm4, 1.0, %v587_v52 }
  0x21   : > { %v316_v28 = vperm.slane %v302_v27, 0 }
  0x23   : > { %vm317_vm5 = vcmp.eq.s32.totalorder %v316_v28, 1 }
  0x28   : > { %258 = vxpose.xlu1.b32.cont [3/16] (narrow) %v242_v5, 8 }
  0x30   : > { %259 = vxpose.xlu1.b32.cont [4/16] (narrow) %v243_v6, 8 }
  0x38   : > { %260 = vxpose.xlu1.b32.cont [5/16] (narrow) %v244_v7, 8 }
  0x40   : > { %261 = vxpose.xlu1.b32.cont [6/16] (narrow) %v245_v8, 8 }
  0x48   : > { %262 = vxpose.xlu1.b32.cont [7/16] (narrow) %v246_v9, 8 }
  0x50   : > { %263 = vxpose.xlu1.b32.cont [8/16] (narrow) %v247_v10, 8 }
  0x58   : > { %264 = vxpose.xlu1.b32.cont [9/16] (narrow) %v248_v11, 8 }
  0x60   : > { %265 = vxpose.xlu1.b32.cont [10/16] (narrow) %v249_v12, 8 }
  0x68   : > { %266 = vxpose.xlu1.b32.cont [11/16] (narrow) %v250_v13, 8 }
  0x70   : > { %267 = vxpose.xlu1.b32.cont [12/16] (narrow) %v251_v15, 8  ;;  %v326_v39 = vpop.permute.xlu2 %325 }
  0x71   : > { %v328_v41 = vsel %vm322_vm6, %v326_v39, 0.0 }
  0x72   : > { %v356_v44 = vrot.slane %v328_v41, 4 }
  0x74   : > { %v357_v46 = vadd.f32 %v356_v44, %v328_v41 }
  0x76   : > { %v358_v48 = vrot.slane %v357_v46, 2 }
  0x78   : > { %268 = vxpose.xlu1.b32.cont [13/16] (narrow) %v252_v16, 8  ;;  %v359_v49 = vadd.f32 %v358_v48, %v357_v46 }
  0x7a   : > { %v360_v50 = vrot.slane %v359_v49, 1 }
  0x7c   : > { %v361_v51 = vadd.f32 %v360_v50, %v359_v49 }
  0x7e   : > { %v362_v55 = vmul.f32 %v467_v53, %v361_v51 }
  0x80   : > { %269 = vxpose.xlu1.b32.cont [14/16] (narrow) %v253_v17, 8  ;;  %v367_v57 = vsel %vm363_vm7, %v362_v55, 0.0 }
  0x81   : > { %368 = vadd.xlane.f32.xlu0 %v367_v57 }
  0x87   : > { %v307_v26 = vpop.permute.xlu0 %306 }
  0x88   : > { %270 = vxpose.xlu1.b32.cont [15/16] (narrow) %v254_v18, 8 }
  0x8f   : > { %v313_v31 = vpop.permute.xlu0 %312 }
  0x90   : > { %271 = vxpose.xlu1.b32.end [16/16] (narrow) %v255_v19, 8 }
  0xbc   : > { %v272_v29 = vpop.trf.xlu1 }
  0xbd   : > { %v309_v30 = vmul.f32 %v307_v26, %v272_v29 }
  0xbf   : > { %v315_v32 = vadd.f32 %v313_v31, %v309_v30 }
  0xc1   : > { %v318_v33 = vsel %vm317_vm5, %v315_v32, 0.0 }
  0xc2   : > { %v329_v34 = vrot.slane %v318_v33, 4 }
  0xc4   : > { %v330_v37 = vmax.f32 %v318_v33, %v329_v34 }
  0xc6   : > { %v331_v38 = vrot.slane %v330_v37, 2 }
  0xc8   : > { %v332_v40 = vmax.f32 %v330_v37, %v331_v38 }
  0xca   : > { %v333_v42 = vrot.slane %v332_v40, 1 }
  0xcc   : > { %v334_v43 = vmax.f32 %v332_v40, %v333_v42 }
  0xce   : > { %v335_v45 = vsub.f32 %v318_v33, %v334_v43 }
  0xd0   : > { %v336_v47 = vmul.f32 1.442695, %v335_v45 }
  0xd2   : > { %518 = vpow2.f32 %v336_v47 }
  0xd8   : > { %v519_v54 = vpop.eup %518 }
  0xd9   : > { %v338_v56 = vrot.slane %v519_v54, 4 }
  0xdb   : > { %v339_v58 = vadd.f32 %v519_v54, %v338_v56 }
  0xdd   : > { %v340_v59 = vrot.slane %v339_v58, 2 }
  0xdf   : > { %v341_v60 = vadd.f32 %v340_v59, %v339_v58 }
  0xe1   : > { %v342_v61 = vrot.slane %v341_v60, 1 }
  0xe3   : > { %v343_v62 = vadd.f32 %v342_v61, %v341_v60 }
  0xe5   : > { %520 = vlog2.f32 %v343_v62 }
  0xeb   : > { %v521_v63 = vpop.eup %520 }
  0xec   : > { %v345_v0 = vmul.f32 0.6931472, %v521_v63 }
  0xee   : > { %v346_v1 = vadd.f32 %v345_v0, %v334_v43 }
  0xf0   : > { %v347_v2 = vsub.f32 %v346_v1, %v318_v33 }
  0xf2   : > { %v348_v3 = vmul.f32 %v347_v2, %v328_v41 }
  0xf4   : > { %v349_v4 = vrot.slane %v348_v3, 4  ;;  %v369_v12 = vpop.xlane.xlu0 %368 }
  0xf5   : > { %v372_v13 = vperm.slane %v369_v12, 0 }
  0xf6   : > { %v350_v5 = vadd.f32 %v349_v4, %v348_v3 }
  0xf7   : > { %373 = vst [vmem:[%s229_s8 + $0x8] sm:$0xff] %v372_v13 }
  0xf8   : > { %v351_v6 = vrot.slane %v350_v5, 2 }
  0xfa   : > { %v352_v7 = vadd.f32 %v351_v6, %v350_v5 }
  0xfc   : > { %v353_v8 = vrot.slane %v352_v7, 1 }
  0xfe   : > { %v354_v9 = vadd.f32 %v353_v8, %v352_v7 }
 0x100   : > { %v355_v10 = vmul.f32 %v467_v53, %v354_v9 }
 0x102   : > { %v364_v11 = vsel %vm363_vm7, %v355_v10, 0.0 }
 0x103   : > { %365 = vadd.xlane.f32.xlu2 %v364_v11 }
 0x176   : > { %v366_v14 = vpop.xlane.xlu2 %365 }
 0x177   : > { %v370_v15 = vperm.slane %v366_v14, 0 }
 0x179   : > { %371 = vst [vmem:[%s229_s8] sm:$0xff] %v370_v15 }
 0x17a   : > { %549 = shalt.err (!%p546_p4)
}
 0x17b   : > { %474 = dma.vmem_to_hbm [thread:$0]  (%p656_p5), %s389_s12, 256, %s391_s13, %s375_s14  }
 0x17c PF: > { %p480_p7 = scmp.ge.s32.totalorder %s584_s21, 2  ;;  %s402_s6 = sand.u32 1, %s572_s18  }
 0x17d   : > { %s403_s22 = scalar_lea.sflag [#allocation3], %s402_s6 }
 0x17e   : > { %p477_p8 = pnand %p480_p7, %p660_p6 }
 0x180   : > { %p478_p9 = pneg %p477_p8 }
 0x182   : > { %567 = dma.done.wait (%p478_p9), %s403_s22, 256  }
 0x183   : > { %569 = vsyncadd (%p478_p9), %s403_s22, 4294967040  ;;  %p15_p10 = scmp.ge.s32.totalorder %s643_s24, 5   ;;  %s759_s18 = smov %s576_s19 }
 0x184   : > { %s760_s19 = smov %s580_s20  ;;  %s761_s20 = smov %s654_s27 }
 0x185   : > { %s762_s21 = smov %s643_s24  ;;  %17 = sbr.rel (!%p15_p10) target bundleno = 3 (0x3), region = 78 }
 0x18a   :  { %409 = vsyncpa [#allocation3], 1 }
 0x18b   :  { %411 = vsyncpa [#allocation3 + $0x1], 1 }

</bundles_post_ra>
